<compile_context>
chip_gen: v5e
topology: v5e:2x2
jax: 0.10.0
libtpu: 0.0.40
codegen_flags: <defaults>
</compile_context>

<pallas_src>
import numpy as np
import jax
import jax.numpy as jnp
from jax.experimental import pallas as pl
from jax.experimental.pallas import tpu as pltpu

_EPS = 1e-5


def _device_vmem_bytes(default=64 << 20):
    """Per-core VMEM capacity; conservative 64 MiB fallback if unqueryable."""
    try:
        cap = int(pltpu.get_tpu_info().vmem_capacity_bytes)
        return cap if cap > 0 else default
    except Exception:
        return default


def _pick_batch_tile(batch, hidden, cap=512):
    """Largest divisor bt of `batch` with bt*hidden a multiple of 128,
    preferring lane widths <= cap and >= 2 batch blocks (megacore sharding)."""
    divisors = [bt for bt in range(1, batch + 1) if batch % bt == 0]
    aligned = [bt for bt in divisors if (bt * hidden) % 128 == 0]
    if not aligned:
        raise ValueError(
            "No 128-lane-aligned batch tile exists for batch="
            f"{batch}, hidden={hidden}; pad hidden (or batch) so some divisor "
            "bt of batch gives bt*hidden % 128 == 0.")
    capped = [bt for bt in aligned if bt * hidden <= cap]
    pool = capped if capped else [min(aligned, key=lambda bt: bt * hidden)]
    multi = [bt for bt in pool if batch // bt >= 2]
    pool = multi if multi else pool
    return max(pool)


# --------------------------------------------------------------------------
# Pallas kernel.  Grid = (batch_blocks "parallel", freq_chunks "arbitrary").
# One (L, B_t*H) activation slab per batch block; one (2*Lf_t)-row frequency
# chunk per inner step, accumulated straight into the resident output slab.
# --------------------------------------------------------------------------
def _lmufft_kernel(x_ref, cf_ref, d_ref, wa_ref, wb_ref, wm_ref, wx_ref,
                   cb_ref, bns_ref, bnb_ref, o_ref):
    kf = pl.program_id(1)
    n_kf = pl.num_programs(1)
    lf_t = cf_ref.shape[0] // 2          # static frequency-tile size
    seq = x_ref.shape[0]
    nl = x_ref.shape[1]                  # B_t * H lanes

    xb = x_ref[...]                      # (L, Nl) bf16 (cast done on host)

    # ---- forward rfft chunk: ONE fused MXU dot -----------------------------
    # cf chunk = [cos ; -sin]  ->  u = [u_re ; u_im]               (2*Lf_t, Nl)
    u = jnp.dot(cf_ref[...], xb, preferred_element_type=jnp.float32)

    # ---- complex pointwise multiply with W = w_fft1 (x) w_fft2 --------------
    # With u stacked as [u_re; u_im], a half-height roll swaps the halves:
    #   y = u*[w_re; w_re] + roll(u, Lf_t)*[-w_im; w_im] = [y_re ; y_im]
    wa = wa_ref[...].astype(jnp.float32)
    wb = wb_ref[...].astype(jnp.float32)
    y = (u * wa + pltpu.roll(u, lf_t, 0) * wb).astype(jnp.bfloat16)

    # ---- partial irfft chunk: ONE fused dot, accumulated into o_ref ---------
    # d chunk = [dr | di]  ->  m_part = dr@y_re + di@y_im            (L, Nl)
    m_part = jnp.dot(d_ref[...], y, preferred_element_type=jnp.float32)

    @pl.when(kf == 0)
    def _first():
        o_ref[...] = m_part              # direct write: no zero-init + "+="

    @pl.when(kf != 0)
    def _accum():
        o_ref[...] += m_part

    # ---- epilogue on the last frequency chunk: conv + BN + ELU --------------
    @pl.when(kf == n_kf - 1)
    def _epilogue():
        mb = o_ref[...].astype(jnp.bfloat16)            # accumulated m, bf16
        row = jax.lax.broadcasted_iota(jnp.int32, (seq, nl), 0)

        # Conv1d(2H->H, k=3, pad=1) on concat([m, x], -1): per-tap dots against
        # (Nl, Nl) block-diagonal weight slabs (B_t batch slots on the
        # diagonal) — no (L, 3*Nl) intermediate is ever materialised.  The
        # block diagonal wastes a factor B_t of MXU flops on the conv but
        # keeps activations lane-dense; the O(L^2) DFT dots dominate at LRA
        # sequence lengths.
        def tap(k):
            wm_k = wm_ref[pl.ds(k * nl, nl), :]
            wx_k = wx_ref[pl.ds(k * nl, nl), :]
            return (jnp.dot(mb, wm_k, preferred_element_type=jnp.float32) +
                    jnp.dot(xb, wx_k, preferred_element_type=jnp.float32))

        h = tap(1)                                                    # input @ t
        h = h + jnp.where(row == 0, 0.0,
                          pltpu.roll(tap(0), 1, 0))                   # input @ t-1
        h = h + jnp.where(row == seq - 1, 0.0,
                          pltpu.roll(tap(2), seq - 1, 0))             # input @ t+1
        h = h + cb_ref[...]                                           # conv bias
        # BatchNorm1d(seq_len), eval mode, folded to per-position scale/shift.
        h = h * bns_ref[...] + bnb_ref[...]
        # ELU(alpha=1); Dropout is identity in eval mode.
        h = jnp.where(h > 0, h, jnp.exp(jnp.minimum(h, 0.0)) - 1.0)
        o_ref[...] = h.astype(o_ref.dtype)


# --------------------------------------------------------------------------
# Host-side operand packing.
# --------------------------------------------------------------------------
def _prepare_operands(params, hidden, seq_len, batch_tile, lf_tile):
    H, L, Bt = hidden, seq_len, batch_tile
    Nl = Bt * H
    Lf = L // 2 + 1
    n_kf = -(-Lf // lf_tile)
    Lf_pad = n_kf * lf_tile

    # Real-DFT matrices (f64 host-side; cast to bf16 for single-pass MXU).
    l = np.arange(Lf_pad, dtype=np.float64)[:, None]
    s = np.arange(L, dtype=np.float64)[None, :]
    valid = (l < Lf).astype(np.float64)                  # zero padded freq bins
    ang = 2.0 * np.pi * l * s / L
    cr = valid * np.cos(ang)                             # (Lf_pad, L)
    ci = -valid * np.sin(ang)

    # irfft with 1/L scaling + Hermitian doubling folded in.
    c = np.full((1, Lf_pad), 2.0, np.float64)
    c[0, 0] = 1.0
    if L % 2 == 0:
        c[0, L // 2] = 1.0
    coef = valid.T * c / L                               # (1, Lf_pad)
    t_idx = np.arange(L, dtype=np.float64)[:, None]
    ang2 = 2.0 * np.pi * t_idx * l.T / L
    dr = coef * np.cos(ang2)                             # (L, Lf_pad)
    di = -coef * np.sin(ang2)

    # Chunk-interleave so each frequency tile is one contiguous block:
    #   cf chunk rows = [cos ; -sin],  d chunk cols = [dr | di].
    cf = np.concatenate([cr.reshape(n_kf, lf_tile, L),
                         ci.reshape(n_kf, lf_tile, L)], axis=1
                        ).reshape(2 * Lf_pad, L)
    dmat = np.concatenate([dr.reshape(L, n_kf, lf_tile),
                           di.reshape(L, n_kf, lf_tile)], axis=2
                          ).reshape(L, 2 * Lf_pad)

    # Spectral weight W = einsum('lkt,kdt->ldt'), tiled across the Bt batch
    # slots of a block and packed for the half-roll trick:
    #   wa = [w_re; w_re] per chunk,  wb = [-w_im; w_im] per chunk.
    W = np.einsum('lkt,kdt->ldt',
                  np.asarray(params["w_fft1"], np.float64),
                  np.asarray(params["w_fft2"], np.float64))           # (Lf, H, 2)
    w_re = np.zeros((Lf_pad, H)); w_re[:Lf] = W[..., 0]
    w_im = np.zeros((Lf_pad, H)); w_im[:Lf] = W[..., 1]
    w_re_t = np.tile(w_re, (1, Bt))                                   # (Lf_pad, Nl)
    w_im_t = np.tile(w_im, (1, Bt))
    wa = np.concatenate([w_re_t.reshape(n_kf, lf_tile, Nl),
                         w_re_t.reshape(n_kf, lf_tile, Nl)], axis=1
                        ).reshape(2 * Lf_pad, Nl)
    wb = np.concatenate([(-w_im_t).reshape(n_kf, lf_tile, Nl),
                         w_im_t.reshape(n_kf, lf_tile, Nl)], axis=2 - 1
                        ).reshape(2 * Lf_pad, Nl)

    # Conv1d weights: per-tap (Nl, Nl) block-diagonal slabs stacked along rows.
    cw = np.asarray(params["conv_w"], np.float64)                     # (H, 2H, 3)
    wm = np.zeros((3 * Nl, Nl))
    wx = np.zeros((3 * Nl, Nl))
    for k in range(3):
        for j in range(Bt):
            rows = slice(k * Nl + j * H, k * Nl + (j + 1) * H)
            cols = slice(j * H, (j + 1) * H)
            wm[rows, cols] = cw[:, :H, k].T
            wx[rows, cols] = cw[:, H:, k].T
    cb = np.tile(np.asarray(params["conv_b"]), Bt).reshape(1, Nl)

    # BatchNorm1d(seq_len) folded to per-position scale/shift (eval mode).
    scale = np.asarray(params["gamma"]) / np.sqrt(np.asarray(params["r_var"]) + _EPS)
    shift = np.asarray(params["beta"]) - np.asarray(params["r_mean"]) * scale
    bn_s = scale.reshape(L, 1)
    bn_b = shift.reshape(L, 1)

    ops = dict(
        cf=jnp.asarray(cf, jnp.bfloat16),
        d=jnp.asarray(dmat, jnp.bfloat16),
        wa=jnp.asarray(wa, jnp.bfloat16),
        wb=jnp.asarray(wb, jnp.bfloat16),
        wm=jnp.asarray(wm, jnp.bfloat16),
        wx=jnp.asarray(wx, jnp.bfloat16),
        cb=jnp.asarray(cb, jnp.float32),
        bn_s=jnp.asarray(bn_s, jnp.float32),
        bn_b=jnp.asarray(bn_b, jnp.float32),
    )
    return ops, n_kf


def lmufft_forward(x, params, *, lf_tile=None, batch_tile=None):
    """Forward pass of LMUFFT_nccl1 (eval semantics) as one Pallas TPU call."""
    B, L, H = x.shape
    Bt = batch_tile if batch_tile is not None else _pick_batch_tile(B, H)
    assert B % Bt == 0
    Nl = Bt * H
    if Nl % 128 != 0:
        raise ValueError(f"batch tile lane width {Nl} must be a multiple of 128")
    Lf = L // 2 + 1

    dev_vmem = _device_vmem_bytes()
    small_vmem = dev_vmem <= (64 << 20)          # v7x-class parts
    if lf_tile is None:
        if Lf <= 128:
            lf_tile = 128
        else:
            lf_tile = 128 if small_vmem else 256  # halve streamed chunks on v7x
    ops, n_kf = _prepare_operands(params, H, L, Bt, lf_tile)
    lf_t = lf_tile
    nb = B // Bt

    # Lane-dense activation layout: (L, B*H), bf16; batch block b = columns
    # [b*Nl, (b+1)*Nl).  (Host-side transpose is plain XLA, outside the kernel.)
    # TODO(synk): accept/return the (L, B*H) layout at the module boundary (or
    #             use allow_input_fusion) to avoid the transpose HBM round-trip
    #             when B*H is large relative to L.
    x_flat = jnp.transpose(x, (1, 0, 2)).reshape(L, B * H).astype(jnp.bfloat16)

    const = lambda b, kf: (0, 0)
    single = pl.Buffered(1)                      # grid-invariant: single buffer
    freq_single = (n_kf == 1)

    def fspec(shape, imap):
        # Frequency-chunked operands: default double-buffering while streaming
        # over kf; single-buffer when there is only one chunk.
        if freq_single:
            return pl.BlockSpec(shape, imap, pipeline_mode=single)
        return pl.BlockSpec(shape, imap)

    # Exact per-tile VMEM estimate (pipeline buffers + live intermediates).
    def vmem_estimate(x_bufs):
        bf16, f32 = 2, 4
        return (
            x_bufs * L * Nl * bf16                 # x slab(s), bf16
            + 2 * L * Nl * f32                     # output slab, double-buffered
            + 2 * (2 * lf_t) * L * bf16            # cf chunks, 2 buffers
            + 2 * L * (2 * lf_t) * bf16            # d chunks, 2 buffers
            + 2 * 2 * (2 * lf_t) * Nl * bf16       # wa + wb chunks, 2 buffers
            + 2 * (3 * Nl) * Nl * bf16             # wm + wx, single-buffered
            + 8 * max(Nl, 128) * f32               # conv bias (tile-padded)
            + 2 * L * 128 * f32                    # bn scale / shift (lane-padded)
            + (2 * lf_t) * Nl * (2 * f32 + bf16)   # u, roll(u), y intermediates
            + 3 * L * Nl * f32                     # m_part / tap results / h
            + L * Nl * bf16                        # mb in epilogue
        )

    x_bufs = 2
    if vmem_estimate(x_bufs) * 1.25 > dev_vmem * 0.75:
        x_bufs = 1                                 # drop x double-buffer if tight
    est = vmem_estimate(x_bufs)
    vmem_limit = int(min(max(est * 1.25, 32 << 20), dev_vmem * 0.9))

    if x_bufs == 2:
        x_spec = pl.BlockSpec((L, Nl), lambda b, kf: (0, b))
    else:
        x_spec = pl.BlockSpec((L, Nl), lambda b, kf: (0, b), pipeline_mode=single)

    in_specs = [
        x_spec,                                                      # x slab (bf16)
        fspec((2 * lf_t, L), lambda b, kf: (kf, 0)),                 # [cos;-sin] chunk
        fspec((L, 2 * lf_t), lambda b, kf: (0, kf)),                 # [dr|di] chunk
        fspec((2 * lf_t, Nl), lambda b, kf: (kf, 0)),                # wa chunk
        fspec((2 * lf_t, Nl), lambda b, kf: (kf, 0)),                # wb chunk
        pl.BlockSpec((3 * Nl, Nl), const, pipeline_mode=single),     # conv taps (m)
        pl.BlockSpec((3 * Nl, Nl), const, pipeline_mode=single),     # conv taps (x)
        pl.BlockSpec((1, Nl), const, pipeline_mode=single),          # conv bias
        pl.BlockSpec((L, 1), const, pipeline_mode=single),           # bn scale
        pl.BlockSpec((L, 1), const, pipeline_mode=single),           # bn shift
    ]
    out_spec = pl.BlockSpec((L, Nl), lambda b, kf: (0, b))

    out_flat = pl.pallas_call(
        _lmufft_kernel,
        out_shape=jax.ShapeDtypeStruct((L, B * H), jnp.float32),
        grid_spec=pltpu.PrefetchScalarGridSpec(
            num_scalar_prefetch=0,
            grid=(nb, n_kf),                       # reduction (freq) axis last
            in_specs=in_specs,
            out_specs=out_spec,
        ),
        compiler_params=pltpu.CompilerParams(
            dimension_semantics=("parallel", "arbitrary"),
            vmem_limit_bytes=vmem_limit,
        ),
    )(x_flat, ops["cf"], ops["d"], ops["wa"], ops["wb"],
      ops["wm"], ops["wx"], ops["cb"], ops["bn_s"], ops["bn_b"])

    return out_flat.reshape(L, B, H).transpose(1, 0, 2)


# --------------------------------------------------------------------------
# Deterministic parameter init (shapes from the module's __init__).
# --------------------------------------------------------------------------
def make_params(key, hidden_size, seq_len, kappa=1):
    Lf = seq_len // 2 + 1
    ks = jax.random.split(key, 8)
    b1 = np.sqrt(2.0) * np.sqrt(3.0 / (kappa * 2))          # kaiming-uniform-ish
    b2 = np.sqrt(2.0) * np.sqrt(3.0 / (hidden_size * 2))
    bc = 1.0 / np.sqrt(2 * hidden_size * 3)
    return dict(
        w_fft1=jax.random.uniform(ks[0], (Lf, kappa, 2), jnp.float32, -b1, b1),
        w_fft2=jax.random.uniform(ks[1], (kappa, hidden_size, 2), jnp.float32, -b2, b2),
        conv_w=jax.random.uniform(ks[2], (hidden_size, 2 * hidden_size, 3), jnp.float32, -bc, bc),
        conv_b=jax.random.uniform(ks[3], (hidden_size,), jnp.float32, -bc, bc),
        gamma=jax.random.uniform(ks[4], (seq_len,), jnp.float32, 0.5, 1.5),
        beta=jax.random.uniform(ks[5], (seq_len,), jnp.float32, -0.1, 0.1),
        r_mean=jax.random.uniform(ks[6], (seq_len,), jnp.float32, -0.2, 0.2),
        r_var=jax.random.uniform(ks[7], (seq_len,), jnp.float32, 0.8, 1.2),
    )


# --------------------------------------------------------------------------
# NumPy reference (matches the PyTorch forward in eval mode).
# --------------------------------------------------------------------------
def reference_forward(x, p, seq_len):
    x = np.asarray(x, np.float64)
    L = seq_len
    fft_u = np.fft.rfft(x, n=L, axis=-2)                           # (B, Lf, H)
    W = np.einsum('lkt,kdt->ldt',
                  np.asarray(p["w_fft1"], np.float64),
                  np.asarray(p["w_fft2"], np.float64))
    out_ft = fft_u * (W[..., 0] + 1j * W[..., 1])[None]
    m = np.fft.irfft(out_ft, n=L, axis=-2)                         # (B, L, H)
    inp = np.concatenate([m, x], axis=-1)                          # (B, L, 2H)
    pad = np.pad(inp, ((0, 0), (1, 1), (0, 0)))
    taps = np.stack([pad[:, k:k + L] for k in range(3)], axis=2)   # (B, L, 3, 2H)
    cw = np.asarray(p["conv_w"], np.float64)
    h = np.einsum('btkc,ock->bto', taps, cw) + np.asarray(p["conv_b"], np.float64)
    rm = np.asarray(p["r_mean"], np.float64)[None, :, None]
    rv = np.asarray(p["r_var"], np.float64)[None, :, None]
    g = np.asarray(p["gamma"], np.float64)[None, :, None]
    b = np.asarray(p["beta"], np.float64)[None, :, None]
    h = (h - rm) / np.sqrt(rv + _EPS) * g + b
    h = np.where(h > 0, h, np.exp(h) - 1.0)                        # ELU
    return h


if __name__ == "__main__":
    hidden_size, seq_len, batch = 32, 16, 8   # -> B_t=4, lane width 128, 2 blocks
    key = jax.random.PRNGKey(0)
    kx, kp = jax.random.split(key)
    x = jax.random.normal(kx, (batch, seq_len, hidden_size), jnp.float32)

    params = make_params(kp, hidden_size, seq_len)

    out = lmufft_forward(x, params)
    out = jax.block_until_ready(out)

    ref = reference_forward(np.asarray(x), params, seq_len)
    assert out.shape == (batch, seq_len, hidden_size)
    # bf16 MXU inputs + bf16 spectral weights (precision relaxed per the perf
    # review) -> loose tolerance.  TODO(synk): re-validate at LRA lengths.
    np.testing.assert_allclose(np.asarray(out), ref, atol=2.5e-2, rtol=2.5e-2)
    print("KERNEL_OK")
</pallas_src>

<mosaic_0001>
module attributes {stable_mosaic.version = 11 : i64} {
  func.func @_lmufft_kernel(%arg0: i32, %arg1: i32, %arg2: memref<16x128xbf16, #tpu.memory_space<vmem>>, %arg3: memref<256x16xbf16, #tpu.memory_space<vmem>>, %arg4: memref<16x256xbf16, #tpu.memory_space<vmem>>, %arg5: memref<256x128xbf16, #tpu.memory_space<vmem>>, %arg6: memref<256x128xbf16, #tpu.memory_space<vmem>>, %arg7: memref<384x128xbf16, #tpu.memory_space<vmem>>, %arg8: memref<384x128xbf16, #tpu.memory_space<vmem>>, %arg9: memref<1x128xf32, #tpu.memory_space<vmem>>, %arg10: memref<16x1xf32, #tpu.memory_space<vmem>>, %arg11: memref<16x1xf32, #tpu.memory_space<vmem>>, %arg12: memref<16x128xf32, #tpu.memory_space<vmem>>) attributes {dimension_semantics = [#tpu.dimension_semantics<parallel>, #tpu.dimension_semantics<arbitrary>], iteration_bounds = array<i64: 2, 1>, scalar_prefetch = 0 : i64, scratch_operands = 0 : i64, tpu.core_type = #tpu.core_type<tc>, window_params = [{transform_indices = @transform_0, window_bounds = array<i64: 16, 128>}, {pipeline_mode = #tpu.pipeline_mode<synchronous>, transform_indices = @transform_1, window_bounds = array<i64: 256, 16>}, {pipeline_mode = #tpu.pipeline_mode<synchronous>, transform_indices = @transform_2, window_bounds = array<i64: 16, 256>}, {pipeline_mode = #tpu.pipeline_mode<synchronous>, transform_indices = @transform_3, window_bounds = array<i64: 256, 128>}, {pipeline_mode = #tpu.pipeline_mode<synchronous>, transform_indices = @transform_4, window_bounds = array<i64: 256, 128>}, {pipeline_mode = #tpu.pipeline_mode<synchronous>, transform_indices = @transform_5, window_bounds = array<i64: 384, 128>}, {pipeline_mode = #tpu.pipeline_mode<synchronous>, transform_indices = @transform_6, window_bounds = array<i64: 384, 128>}, {pipeline_mode = #tpu.pipeline_mode<synchronous>, transform_indices = @transform_7, window_bounds = array<i64: 1, 128>}, {pipeline_mode = #tpu.pipeline_mode<synchronous>, transform_indices = @transform_8, window_bounds = array<i64: 16, 1>}, {pipeline_mode = #tpu.pipeline_mode<synchronous>, transform_indices = @transform_9, window_bounds = array<i64: 16, 1>}, {transform_indices = @transform_10, window_bounds = array<i64: 16, 128>}]} {
    %c0 = arith.constant 0 : index
    %c0_0 = arith.constant 0 : index
    %0 = vector.load %arg2[%c0, %c0_0] : memref<16x128xbf16, #tpu.memory_space<vmem>>, vector<16x128xbf16>
    %c0_1 = arith.constant 0 : index
    %c0_2 = arith.constant 0 : index
    %1 = vector.load %arg3[%c0_1, %c0_2] : memref<256x16xbf16, #tpu.memory_space<vmem>>, vector<256x16xbf16>
    %cst = arith.constant dense<0.000000e+00> : vector<256x128xf32>
    %2 = tpu.matmul %1, %0, %cst {dimension_numbers = #tpu.dot_dimension_numbers<[1], [0], [0], [1], [0, 0, 1, 1], [], []>} : vector<256x16xbf16>, vector<16x128xbf16>, vector<256x128xf32> -> vector<256x128xf32>
    %c0_3 = arith.constant 0 : index
    %c0_4 = arith.constant 0 : index
    %3 = vector.load %arg5[%c0_3, %c0_4] : memref<256x128xbf16, #tpu.memory_space<vmem>>, vector<256x128xbf16>
    %4 = arith.extf %3 : vector<256x128xbf16> to vector<256x128xf32>
    %c0_5 = arith.constant 0 : index
    %c0_6 = arith.constant 0 : index
    %5 = vector.load %arg6[%c0_5, %c0_6] : memref<256x128xbf16, #tpu.memory_space<vmem>>, vector<256x128xbf16>
    %6 = arith.extf %5 : vector<256x128xbf16> to vector<256x128xf32>
    %7 = arith.mulf %2, %4 : vector<256x128xf32>
    %c128_i32 = arith.constant 128 : i32
    %8 = tpu.dynamic_rotate %2 by %c128_i32 dim 0 : vector<256x128xf32>, i32 -> vector<256x128xf32>
    %9 = arith.mulf %8, %6 : vector<256x128xf32>
    %10 = arith.addf %7, %9 : vector<256x128xf32>
    %11 = arith.truncf %10 : vector<256x128xf32> to vector<256x128xbf16>
    %c0_7 = arith.constant 0 : index
    %c0_8 = arith.constant 0 : index
    %12 = vector.load %arg4[%c0_7, %c0_8] : memref<16x256xbf16, #tpu.memory_space<vmem>>, vector<16x256xbf16>
    %cst_9 = arith.constant dense<0.000000e+00> : vector<16x128xf32>
    %13 = tpu.matmul %12, %11, %cst_9 {dimension_numbers = #tpu.dot_dimension_numbers<[1], [0], [0], [1], [0, 0, 1, 1], [], []>} : vector<16x256xbf16>, vector<256x128xbf16>, vector<16x128xf32> -> vector<16x128xf32>
    %c0_i32 = arith.constant 0 : i32
    %14 = arith.cmpi eq, %arg1, %c0_i32 : i32
    %15 = arith.extui %14 : i1 to i32
    %c0_i32_10 = arith.constant 0 : i32
    %16 = arith.cmpi ne, %15, %c0_i32_10 : i32
    scf.if %16 {
      %c0_15 = arith.constant 0 : index
      %c0_16 = arith.constant 0 : index
      %23 = vector.load %arg12[%c0_15, %c0_16] : memref<16x128xf32, #tpu.memory_space<vmem>>, vector<16x128xf32>
      tpu.vector_store %arg12[%c0_15, %c0_16], %13 {strides = array<i32>} : memref<16x128xf32, #tpu.memory_space<vmem>>, vector<16x128xf32>,
    } else {
    }
    %c0_i32_11 = arith.constant 0 : i32
    %17 = arith.cmpi ne, %arg1, %c0_i32_11 : i32
    %18 = arith.extui %17 : i1 to i32
    %c0_i32_12 = arith.constant 0 : i32
    %19 = arith.cmpi ne, %18, %c0_i32_12 : i32
    scf.if %19 {
      %c0_15 = arith.constant 0 : index
      %c0_16 = arith.constant 0 : index
      %23 = vector.load %arg12[%c0_15, %c0_16] : memref<16x128xf32, #tpu.memory_space<vmem>>, vector<16x128xf32>
      %24 = arith.addf %23, %13 : vector<16x128xf32>
      %c0_17 = arith.constant 0 : index
      %c0_18 = arith.constant 0 : index
      %25 = vector.load %arg12[%c0_17, %c0_18] : memref<16x128xf32, #tpu.memory_space<vmem>>, vector<16x128xf32>
      tpu.vector_store %arg12[%c0_17, %c0_18], %24 {strides = array<i32>} : memref<16x128xf32, #tpu.memory_space<vmem>>, vector<16x128xf32>,
    } else {
    }
    %c0_i32_13 = arith.constant 0 : i32
    %20 = arith.cmpi eq, %arg1, %c0_i32_13 : i32
    %21 = arith.extui %20 : i1 to i32
    %c0_i32_14 = arith.constant 0 : i32
    %22 = arith.cmpi ne, %21, %c0_i32_14 : i32
    scf.if %22 {
      %c0_15 = arith.constant 0 : index
      %c0_16 = arith.constant 0 : index
      %23 = vector.load %arg12[%c0_15, %c0_16] : memref<16x128xf32, #tpu.memory_space<vmem>>, vector<16x128xf32>
      %24 = arith.truncf %23 : vector<16x128xf32> to vector<16x128xbf16>
      %25 = tpu.iota {dimensions = array<i32: 0>} : vector<16x128xi32>
      %c128 = arith.constant 128 : index
      %c0_17 = arith.constant 0 : index
      %26 = vector.load %arg7[%c128, %c0_17] : memref<384x128xbf16, #tpu.memory_space<vmem>>, vector<128x128xbf16>
      %c128_18 = arith.constant 128 : index
      %c0_19 = arith.constant 0 : index
      %27 = vector.load %arg8[%c128_18, %c0_19] : memref<384x128xbf16, #tpu.memory_space<vmem>>, vector<128x128xbf16>
      %cst_20 = arith.constant dense<0.000000e+00> : vector<16x128xf32>
      %28 = tpu.matmul %24, %26, %cst_20 {dimension_numbers = #tpu.dot_dimension_numbers<[1], [0], [0], [1], [0, 0, 1, 1], [], []>} : vector<16x128xbf16>, vector<128x128xbf16>, vector<16x128xf32> -> vector<16x128xf32>
      %cst_21 = arith.constant dense<0.000000e+00> : vector<16x128xf32>
      %29 = tpu.matmul %0, %27, %cst_21 {dimension_numbers = #tpu.dot_dimension_numbers<[1], [0], [0], [1], [0, 0, 1, 1], [], []>} : vector<16x128xbf16>, vector<128x128xbf16>, vector<16x128xf32> -> vector<16x128xf32>
      %30 = arith.addf %28, %29 : vector<16x128xf32>
      %c0_i32_22 = arith.constant 0 : i32
      %31 = vector.broadcast %c0_i32_22 : i32 to vector<16x128xi32>
      %32 = arith.cmpi eq, %25, %31 : vector<16x128xi32>
      %c0_23 = arith.constant 0 : index
      %c0_24 = arith.constant 0 : index
      %33 = vector.load %arg7[%c0_23, %c0_24] : memref<384x128xbf16, #tpu.memory_space<vmem>>, vector<128x128xbf16>
      %c0_25 = arith.constant 0 : index
      %c0_26 = arith.constant 0 : index
      %34 = vector.load %arg8[%c0_25, %c0_26] : memref<384x128xbf16, #tpu.memory_space<vmem>>, vector<128x128xbf16>
      %cst_27 = arith.constant dense<0.000000e+00> : vector<16x128xf32>
      %35 = tpu.matmul %24, %33, %cst_27 {dimension_numbers = #tpu.dot_dimension_numbers<[1], [0], [0], [1], [0, 0, 1, 1], [], []>} : vector<16x128xbf16>, vector<128x128xbf16>, vector<16x128xf32> -> vector<16x128xf32>
      %cst_28 = arith.constant dense<0.000000e+00> : vector<16x128xf32>
      %36 = tpu.matmul %0, %34, %cst_28 {dimension_numbers = #tpu.dot_dimension_numbers<[1], [0], [0], [1], [0, 0, 1, 1], [], []>} : vector<16x128xbf16>, vector<128x128xbf16>, vector<16x128xf32> -> vector<16x128xf32>
      %37 = arith.addf %35, %36 : vector<16x128xf32>
      %c1_i32 = arith.constant 1 : i32
      %38 = tpu.dynamic_rotate %37 by %c1_i32 dim 0 : vector<16x128xf32>, i32 -> vector<16x128xf32>
      %cst_29 = arith.constant 0.000000e+00 : f32
      %39 = vector.broadcast %cst_29 : f32 to vector<16x128xf32>
      %40 = arith.select %32, %39, %38 : vector<16x128xi1>, vector<16x128xf32>
      %41 = arith.addf %30, %40 : vector<16x128xf32>
      %c15_i32 = arith.constant 15 : i32
      %42 = vector.broadcast %c15_i32 : i32 to vector<16x128xi32>
      %43 = arith.cmpi eq, %25, %42 : vector<16x128xi32>
      %c256 = arith.constant 256 : index
      %c0_30 = arith.constant 0 : index
      %44 = vector.load %arg7[%c256, %c0_30] : memref<384x128xbf16, #tpu.memory_space<vmem>>, vector<128x128xbf16>
      %c256_31 = arith.constant 256 : index
      %c0_32 = arith.constant 0 : index
      %45 = vector.load %arg8[%c256_31, %c0_32] : memref<384x128xbf16, #tpu.memory_space<vmem>>, vector<128x128xbf16>
      %cst_33 = arith.constant dense<0.000000e+00> : vector<16x128xf32>
      %46 = tpu.matmul %24, %44, %cst_33 {dimension_numbers = #tpu.dot_dimension_numbers<[1], [0], [0], [1], [0, 0, 1, 1], [], []>} : vector<16x128xbf16>, vector<128x128xbf16>, vector<16x128xf32> -> vector<16x128xf32>
      %cst_34 = arith.constant dense<0.000000e+00> : vector<16x128xf32>
      %47 = tpu.matmul %0, %45, %cst_34 {dimension_numbers = #tpu.dot_dimension_numbers<[1], [0], [0], [1], [0, 0, 1, 1], [], []>} : vector<16x128xbf16>, vector<128x128xbf16>, vector<16x128xf32> -> vector<16x128xf32>
      %48 = arith.addf %46, %47 : vector<16x128xf32>
      %c15_i32_35 = arith.constant 15 : i32
      %49 = tpu.dynamic_rotate %48 by %c15_i32_35 dim 0 : vector<16x128xf32>, i32 -> vector<16x128xf32>
      %cst_36 = arith.constant 0.000000e+00 : f32
      %50 = vector.broadcast %cst_36 : f32 to vector<16x128xf32>
      %51 = arith.select %43, %50, %49 : vector<16x128xi1>, vector<16x128xf32>
      %52 = arith.addf %41, %51 : vector<16x128xf32>
      %c0_37 = arith.constant 0 : index
      %c0_38 = arith.constant 0 : index
      %53 = vector.load %arg9[%c0_37, %c0_38] : memref<1x128xf32, #tpu.memory_space<vmem>>, vector<1x128xf32>
      %54 = vector.broadcast %53 : vector<1x128xf32> to vector<16x128xf32>
      %55 = arith.addf %52, %54 : vector<16x128xf32>
      %c0_39 = arith.constant 0 : index
      %c0_40 = arith.constant 0 : index
      %56 = vector.load %arg10[%c0_39, %c0_40] : memref<16x1xf32, #tpu.memory_space<vmem>>, vector<16x1xf32>
      %57 = vector.broadcast %56 : vector<16x1xf32> to vector<16x128xf32>
      %58 = arith.mulf %55, %57 : vector<16x128xf32>
      %c0_41 = arith.constant 0 : index
      %c0_42 = arith.constant 0 : index
      %59 = vector.load %arg11[%c0_41, %c0_42] : memref<16x1xf32, #tpu.memory_space<vmem>>, vector<16x1xf32>
      %60 = vector.broadcast %59 : vector<16x1xf32> to vector<16x128xf32>
      %61 = arith.addf %58, %60 : vector<16x128xf32>
      %cst_43 = arith.constant 0.000000e+00 : f32
      %62 = vector.broadcast %cst_43 : f32 to vector<16x128xf32>
      %63 = arith.cmpf ogt, %61, %62 : vector<16x128xf32>
      %cst_44 = arith.constant 0.000000e+00 : f32
      %64 = vector.broadcast %cst_44 : f32 to vector<16x128xf32>
      %65 = arith.minimumf %61, %64 : vector<16x128xf32>
      %66 = math.exp %65 : vector<16x128xf32>
      %cst_45 = arith.constant 1.000000e+00 : f32
      %67 = vector.broadcast %cst_45 : f32 to vector<16x128xf32>
      %68 = arith.subf %66, %67 : vector<16x128xf32>
      %69 = arith.select %63, %61, %68 : vector<16x128xi1>, vector<16x128xf32>
      %c0_46 = arith.constant 0 : index
      %c0_47 = arith.constant 0 : index
      %70 = vector.load %arg12[%c0_46, %c0_47] : memref<16x128xf32, #tpu.memory_space<vmem>>, vector<16x128xf32>
      tpu.vector_store %arg12[%c0_46, %c0_47], %69 {strides = array<i32>} : memref<16x128xf32, #tpu.memory_space<vmem>>, vector<16x128xf32>,
    } else {
    }
    return
  }
  func.func @transform_0(%arg0: i32, %arg1: i32) -> (i32, i32) {
    %c0_i32 = arith.constant 0 : i32
    %c0_i32_0 = arith.constant 0 : i32
    return %c0_i32, %arg0 : i32, i32
  }
  func.func @transform_1(%arg0: i32, %arg1: i32) -> (i32, i32) {
    %c0_i32 = arith.constant 0 : i32
    %c0_i32_0 = arith.constant 0 : i32
    return %arg1, %c0_i32 : i32, i32
  }
  func.func @transform_2(%arg0: i32, %arg1: i32) -> (i32, i32) {
    %c0_i32 = arith.constant 0 : i32
    %c0_i32_0 = arith.constant 0 : i32
    return %c0_i32, %arg1 : i32, i32
  }
  func.func @transform_3(%arg0: i32, %arg1: i32) -> (i32, i32) {
    %c0_i32 = arith.constant 0 : i32
    %c0_i32_0 = arith.constant 0 : i32
    return %arg1, %c0_i32 : i32, i32
  }
  func.func @transform_4(%arg0: i32, %arg1: i32) -> (i32, i32) {
    %c0_i32 = arith.constant 0 : i32
    %c0_i32_0 = arith.constant 0 : i32
    return %arg1, %c0_i32 : i32, i32
  }
  func.func @transform_5(%arg0: i32, %arg1: i32) -> (i32, i32) {
    %c0_i32 = arith.constant 0 : i32
    %c0_i32_0 = arith.constant 0 : i32
    %c0_i32_1 = arith.constant 0 : i32
    return %c0_i32, %c0_i32_0 : i32, i32
  }
  func.func @transform_6(%arg0: i32, %arg1: i32) -> (i32, i32) {
    %c0_i32 = arith.constant 0 : i32
    %c0_i32_0 = arith.constant 0 : i32
    %c0_i32_1 = arith.constant 0 : i32
    return %c0_i32, %c0_i32_0 : i32, i32
  }
  func.func @transform_7(%arg0: i32, %arg1: i32) -> (i32, i32) {
    %c0_i32 = arith.constant 0 : i32
    %c0_i32_0 = arith.constant 0 : i32
    %c0_i32_1 = arith.constant 0 : i32
    return %c0_i32, %c0_i32_0 : i32, i32
  }
  func.func @transform_8(%arg0: i32, %arg1: i32) -> (i32, i32) {
    %c0_i32 = arith.constant 0 : i32
    %c0_i32_0 = arith.constant 0 : i32
    %c0_i32_1 = arith.constant 0 : i32
    return %c0_i32, %c0_i32_0 : i32, i32
  }
  func.func @transform_9(%arg0: i32, %arg1: i32) -> (i32, i32) {
    %c0_i32 = arith.constant 0 : i32
    %c0_i32_0 = arith.constant 0 : i32
    %c0_i32_1 = arith.constant 0 : i32
    return %c0_i32, %c0_i32_0 : i32, i32
  }
  func.func @transform_10(%arg0: i32, %arg1: i32) -> (i32, i32) {
    %c0_i32 = arith.constant 0 : i32
    %c0_i32_0 = arith.constant 0 : i32
    return %c0_i32, %arg0 : i32, i32
  }
}

</mosaic_0001>

<bundles_post_ra>
// kernel: tpu_custom_call.1
= control target key start
LH: loop header
LB: loop body
LE: loop exit
PB: predicated region body
PF: predicated region fallthrough
CT: control target
= control target key end

     0   :  { %s3123_s0 = inlined_call_operand.vmem [shape: bf16[16,256], index: 0, kind: input, shape index: {}]   ;;  %s3124_s1 = inlined_call_operand.vmem [shape: bf16[256,16], index: 1, kind: input, shape index: {}]   ;;  %s3125_s2 = inlined_call_operand.vmem [shape: bf16[16,256], index: 2, kind: input, shape index: {}]   ;;  %s3126_s3 = inlined_call_operand.vmem [shape: bf16[256,128], index: 3, kind: input, shape index: {}]   ;;  %s3127_s4 = inlined_call_operand.hbm [shape: bf16[256,128], index: 4, kind: input, shape index: {}]   ;;  %s3128_s5 = inlined_call_operand.hbm [shape: bf16[384,128], index: 5, kind: input, shape index: {}]   ;;  %s3129_s6 = inlined_call_operand.hbm [shape: bf16[384,128], index: 6, kind: input, shape index: {}]   ;;  %s3130_s7 = inlined_call_operand.vmem [shape: f32[1,128], index: 7, kind: input, shape index: {}]   ;;  %s3131_s8 = inlined_call_operand.vmem [shape: f32[16,1], index: 8, kind: input, shape index: {}]   ;;  %s3132_s9 = inlined_call_operand.vmem [shape: f32[16,1], index: 9, kind: input, shape index: {}]   ;;  %s3133_s10 = inlined_call_operand.hbm [shape: f32[16,256], index: 10, kind: output, shape index: {}]  }
   0x1   :  { %3154 = sst [smem:[#allocation33_spill]] %s3128_s5 }
   0x2   :  { %3155 = sst [smem:[#allocation34_spill]] %s3133_s10 }
   0x3   :  { %15 = vsyncpa [#allocation4], 0 }
   0x4   :  { %16 = vsyncpa [#allocation7], 0 }
   0x5   :  { %17 = vsyncpa [#allocation5], 0 }
   0x6   :  { %19 = vsyncpa [#allocation5 + $0x1], 0  ;;  %s2689_s13 = smov 0   ;;  %s2691_s14 = smov 0  }
   0x7   :  { %s2693_s15 = smov 0   ;;  %s2695_s16 = smov 0  }
   0x8   :  { %s2697_s17 = smov 0   ;;  %s2699_s18 = smov 0  }
   0x9 LB: > { %3156 = sst [smem:[#allocation13_spill]] %s2603_s13  ;;  %s1813_s19 = sadd.s32 4294967295, %s2623_s18   ;;  %s2623_s18 = sphi %s2699_s18, %s25_s18   ;;  %s2619_s17 = sphi %s2697_s17, %s3217_s17   ;;  %s2615_s16 = sphi %s2695_s16, %s3216_s16   ;;  %s2611_s15 = sphi %s2693_s15, %s3215_s15   ;;  %s2607_s14 = sphi %s2691_s14, %s3214_s14   ;;  %s2603_s13 = sphi %s2689_s13, %s3213_s13  }
   0xa   : > { %3157 = sst [smem:[#allocation14_spill]] %s2615_s16  ;;  %s1814_s20 = sadd.s32 4294967294, %s2623_s18  }
   0xb   : > { %s37_s21 = sadd.s32 1, %s2619_s17  ;;  %s44_s22 = sadd.s32 1, %s2611_s15 }
   0xc   : > { %p39_p0 = scmp.ge.s32.totalorder %s37_s21, 2  ;;  %p51_p1 = scmp.ne.s32.totalorder %s2611_s15, %s2607_s14 }
   0xd   : > { %p52_p2 = scmp.eq.s32.totalorder %s2623_s18, 0  ;;  %p290_p3 = scmp.eq.s32.totalorder %s1813_s19, 1 }
   0xe   : > { %s3219_s21 = smov (%p39_p0, %s37_s21), 0  ;;  %p295_p6 = scmp.ne.s32.totalorder %s2607_s14, %s2603_s13 }
   0xf   : > { %3158 = sst [smem:[#allocation15_spill]] %s3219_s21  ;;  %p2728_p4 = por %p52_p2, %p51_p1 }
  0x10   : > { %p2732_p5 = por %p290_p3, %p51_p1  ;;  %s41_s25 = ssub.s32 %s2619_s17, %s3219_s21 }
  0x11   : > { %p42_p7 = scmp.eq.s32.totalorder %s41_s25, 0  ;;  %p296_p8 = scmp.eq.s32.totalorder %s1814_s20, 1 }
  0x12   : > { %s3160_s24 = scalar_select %p2732_p5, 1, 0 }
  0x13   : > { %p1815_p9 = scmp.ge.s32.totalorder %s2623_s18, 1  ;;  %p303_p10 = scmp.lt.s32.totalorder %s2623_s18, 3 }
  0x14   : > { %3161 = sst [smem:[#allocation16_spill]] %s3160_s24  ;;  %p2745_p11 = por %p296_p8, %p295_p6 }
  0x15   : > { %s2743_s26 = scalar_select %p42_p7, %s2611_s15, %s44_s22  }
  0x16   : > { %s3163_s27 = scalar_select %p2745_p11, 1, 0 }
  0x17   : > { %3162 = sst [smem:[#allocation17_spill]] %s2743_s26  ;;  %p2749_p12 = pnand %p1815_p9, %p303_p10 }
  0x18   : > { %3164 = sst [smem:[#allocation18_spill]] %s3163_s27  ;;  %p2753_p13 = scmp.eq.s32.totalorder %s1813_s19, 0 }
  0x19   : > { %p2362_p0 = pneg %p2749_p12  ;;  %s3167_s5 = sld [smem:[#allocation33_spill]] }
  0x1a   : > { %s2625_s22 = smov [#allocation6]   ;;  %s2626_s25 = smov 64  }
  0x1b   : > { %p2764_p1 = pnand %p2753_p13, %p2362_p0  ;;  %s360_s19 = sshll.u32 %s2625_s22, 4  ;;  %s361_s19 = int_to_ptr.vmem [resolvable:$true] %s360_s19 }
  0x1c   : > { %s2627_s21 = smov 4   ;;  %s344_s30 = sshll.u32 %s3127_s4, 4  ;;  %s345_s30 = int_to_ptr.hbm [resolvable:$true] %s344_s30 }
  0x1d   : > { %s2628_s11 = smov [#allocation3]   ;;  %s372_s10 = sshll.u32 %s3129_s6, 4  ;;  %s373_s10 = int_to_ptr.hbm [resolvable:$true] %s372_s10 }
  0x1e   : > { %s2629_s22 = smov [#allocation8]   ;;  %p1822_p2 = scmp.ge.s32.totalorder %s2623_s18, 2 }
  0x1f   : > { %s358_s12 = sshll.u32 %s3167_s5, 4  ;;  %s346_s5 = sshll.u32 %s2628_s11, 4  ;;  %s359_s12 = int_to_ptr.hbm [resolvable:$true] %s358_s12  ;;  %s347_s5 = int_to_ptr.vmem [resolvable:$true] %s346_s5 }
  0x20   : > { %2368 = dma.hbm_to_vmem [thread:$0]  (!%p2764_p1), %s359_s12, 3072, %s361_s19, [#allocation7], %s2626_s25, %s2626_s25, %s2627_s21  }
  0x21   : > { %2365 = dma.hbm_to_vmem [thread:$0]  (!%p2764_p1), %s345_s30, 2048, %s347_s5, [#allocation4], %s2626_s25, %s2626_s25, %s2627_s21  }
  0x22   : > { %s374_s16 = sshll.u32 %s2629_s22, 4  ;;  %393 = sbr.rel (%p1822_p2) target bundleno = 45 (0x2d), region = 52  ;;  %s375_s16 = int_to_ptr.vmem [resolvable:$true] %s374_s16 }
  0x23   : > { %2371 = dma.hbm_to_vmem [thread:$0]  (!%p2764_p1), %s373_s10, 3072, %s375_s16, [#allocation7], %s2626_s25, %s2626_s25, %s2627_s21  }
  0x27   : > { %396 = sbr.rel (!%p2728_p4) target bundleno = 45 (0x2d), region = 56  ;;  %s398_s13 = sand.u32 (%p2728_p4), 1, %s2611_s15  }
  0x28   : > { %s1824_s24 = sshll.u32 (%p2728_p4), %s2619_s17, 2  ;;  %s1823_s26 = sshll.u32 (%p2728_p4), %s398_s13, 3 }
  0x29   : > { %s402_s12 = scalar_lea.vmem (%p2728_p4), %s3123_s0, %s1824_s24  ;;  %s400_s10 = scalar_lea.vmem (%p2728_p4), [#allocation2], %s1823_s26 }
  0x2a   : > { %v419_v0 = vld [vmem:[%s402_s12] sm:$0xf] (%p2728_p4)  ;;  %v421_v1 = vld [vmem:[%s402_s12 + $0x8] sm:$0xf] (%p2728_p4) }
  0x2b   : > { %420 = vst [vmem:[%s400_s10] sm:$0xf] (%p2728_p4), %v419_v0 }
  0x2c   : > { %422 = vst [vmem:[%s400_s10 + $0x4] sm:$0xf] %v421_v1 }
  0x2d PF: > { %453 = sbr.rel (%p2749_p12) target bundleno = 670 (0x29e), region = 97 }
  0x32   : > { %s2793_s16 = sand.u32 1, %s2607_s14  }
  0x33   : > { %s1826_s21 = sshll.u32 %s2793_s16, 3 }
  0x34   : > { %s458_s23 = scalar_lea.vmem [#allocation2], %s1826_s21 }
  0x35   : > { %2590 = dma.done.wait (%p2753_p13), [#allocation4], 2048  }
  0x36   : > { %2592 = vsyncadd (%p2753_p13), [#allocation4], 4294965248 }
  0x37   : > { %2594 = dma.done.wait (%p2753_p13), [#allocation7], 6144  }
  0x38   : > { %2596 = vsyncadd (%p2753_p13), [#allocation7], 4294961152  ;;  %v2804_v2 = vld [vmem:[%s458_s23] sm:$0xff]  ;;  %vm663_vm0 = vcmask 130048   ;;  %v2133_v5 = vld [vmem:[%s3124_s1 + $0x58] sm:$0xff]  ;;  %s3206_s10 = sld [smem:[#allocation14_spill]] }
  0x39   : > { %3169 = vst [vmem:[#allocation19_spill] sm:$0xff] %v2804_v2  ;;  %v2122_v3 = vld [vmem:[%s3124_s1] sm:$0xff]  ;;  %v2131_v4 = vld [vmem:[%s3124_s1 + $0x48] sm:$0xff]  ;;  %719 = vmatpush.bf16.msra.mxu0 %v2804_v2  ;;  %2346 = vmatpush.bf16.msra.mxu1 %v2804_v2  ;;  %v2132_v7 = vld [vmem:[%s3124_s1 + $0x50] sm:$0xff]  ;;  %s1830_s21 = sshll.u32 %s2793_s16, 4  ;;  %s3207_s19 = sld [smem:[#allocation34_spill]] }
  0x3a   : > { %2347 = vmatpush.bf16.msra.mxu3 %v2804_v2  ;;  %v2123_v6 = vld [vmem:[%s3124_s1 + $0x8] sm:$0xff]  ;;  %v2134_v8 = vld [vmem:[%s3124_s1 + $0x60] sm:$0xff]  ;;  %v2124_v9 = vld [vmem:[%s3124_s1 + $0x10] sm:$0xff]  ;;  %s522_s29 = scalar_lea.vmem [#allocation9], %s1830_s21  ;;  %s1645_s13 = scalar_lea.sflag [#allocation5], %s2793_s16 }
  0x3b   : > { %v2135_v10 = vld [vmem:[%s3124_s1 + $0x68] sm:$0xff]  ;;  %v2125_v11 = vld [vmem:[%s3124_s1 + $0x18] sm:$0xff]  ;;  %v2136_v12 = vld [vmem:[%s3124_s1 + $0x70] sm:$0xff]  ;;  %s1656_s30 = sshll.u32 %s522_s29, 4  ;;  %s3086_s30 = int_to_ptr.vmem [resolvable:$true] %s1656_s30 }
  0x3c   : > { %1899 = vmatmul.msk.bf16.vlgmr.msra.gmra.mxu0 %vm663_vm0, %v2122_v3  ;;  %1908 = vmatmul.msk.bf16.vlgmr.msra.gmra.mxu1 %vm663_vm0, %v2131_v4  ;;  %v2126_v13 = vld [vmem:[%s3124_s1 + $0x20] sm:$0xff]  ;;  %v2137_v14 = vld [vmem:[%s3124_s1 + $0x78] sm:$0xff]  ;;  %v2127_v15 = vld [vmem:[%s3124_s1 + $0x28] sm:$0xff] }
  0x3d   : > { %1910 = vmatmul.msk.bf16.vlgmr.msra.gmra.mxu3 %vm663_vm0, %v2133_v5  ;;  %v2128_v16 = vld [vmem:[%s3124_s1 + $0x30] sm:$0xff]  ;;  %v2129_v17 = vld [vmem:[%s3124_s1 + $0x38] sm:$0xff]  ;;  %v2130_v18 = vld [vmem:[%s3124_s1 + $0x40] sm:$0xff] }
  0x3e   : > { %v2324_v22 = vld [vmem:[%s3126_s3 + $0x48] sm:$0xff]   ;;  %v2331_v23 = vld [vmem:[#allocation3 + $0x8] sm:$0xff]   ;;  %v2325_v53 = vld [vmem:[%s3126_s3 + $0x50] sm:$0xff]   ;;  %s2118_s23 = sshll.u32 %s3206_s10, 3 }
  0x3f   : > { %v2316_v25 = vld [vmem:[%s3126_s3 + $0x8] sm:$0xff]   ;;  %v2339_v26 = vld [vmem:[#allocation3 + $0x48] sm:$0xff]   ;;  %v2226_v28 = vunpack.c.l.bf16 %v2324_v22  ;;  %v2258_v29 = vunpack.c.l.bf16 %v2331_v23  ;;  %v2227_v32 = vunpack.c.h.bf16 %v2324_v22  ;;  %v2259_v33 = vunpack.c.h.bf16 %v2331_v23  ;;  %v2332_v54 = vld [vmem:[#allocation3 + $0x10] sm:$0xff]   ;;  %s1655_s25 = scalar_lea.hbm %s3207_s19, %s2118_s23  ;;  %s2557_s12 = scalar_lea.hbm %s3207_s19, 32 }
  0x40   : > { %v2194_v30 = vunpack.c.l.bf16 %v2316_v25  ;;  %v2290_v31 = vunpack.c.l.bf16 %v2339_v26  ;;  %v2195_v34 = vunpack.c.h.bf16 %v2316_v25  ;;  %v2291_v35 = vunpack.c.h.bf16 %v2339_v26  ;;  %v2317_v56 = vld [vmem:[%s3126_s3 + $0x10] sm:$0xff]   ;;  %v2340_v57 = vld [vmem:[#allocation3 + $0x50] sm:$0xff]   ;;  %s1658_s11 = sshll.u32 %s1655_s25, 4  ;;  %s1659_s11 = int_to_ptr.hbm [resolvable:$true] %s1658_s11 }
  0x41   : > { %v2230_v58 = vunpack.c.l.bf16 %v2325_v53  ;;  %v2262_v59 = vunpack.c.l.bf16 %v2332_v54  ;;  %v2198_v60 = vunpack.c.l.bf16 %v2317_v56  ;;  %v2294_v61 = vunpack.c.l.bf16 %v2340_v57  ;;  %s2551_s24 = sshra.s32 %s1659_s11, 4  ;;  %s2552_s24 = int_to_ptr.hbm [resolvable:$true] %s2551_s24 }
  0x42   : > { %v2231_v62 = vunpack.c.h.bf16 %v2325_v53  ;;  %v2263_v63 = vunpack.c.h.bf16 %v2332_v54  ;;  %v2199_v1 = vunpack.c.h.bf16 %v2317_v56  ;;  %v2295_v3 = vunpack.c.h.bf16 %v2340_v57  ;;  %v2935_v56 = vld [vmem:[%s3126_s3 + $0x20] sm:$0xff]   ;;  %v2937_v57 = vld [vmem:[#allocation3 + $0x60] sm:$0xff]   ;;  %s2553_s26 = scalar_lea.hbm %s2552_s24, 16  ;;  %p2558_p7 = scmp.lt.s32.totalorder %s2552_s24, %s3207_s19 }
  0x43   : > { %p2554_p3 = scmp.ne.s32.totalorder %s2552_s24, %s2553_s26  ;;  %p2559_p8 = scmp.lt.s32.totalorder %s2557_s12, %s2553_s26 }
  0x45   : > { %p2555_p4 = pnand %p2554_p3, %p2732_p5  ;;  %p2560_p9 = por %p2559_p8, %p2558_p7 }
  0x47   : > { %p2556_p6 = pneg %p2555_p4 }
  0x49   : > { %p2561_p10 = pnand %p2560_p9, %p2556_p6 }
  0x4c   : > { %1900 = vmatmul.msk.bf16.gmra.mxu0 %vm663_vm0, %v2123_v6  ;;  %1909 = vmatmul.msk.bf16.gmra.mxu1 %vm663_vm0, %v2132_v7 }
  0x4d   : > { %1911 = vmatmul.msk.bf16.gmra.mxu3 %vm663_vm0, %v2134_v8 }
  0x5c   : > { %1901 = vmatmul.msk.bf16.gmra.mxu0 %vm663_vm0, %v2124_v9 }
  0x5d   : > { %1912 = vmatmul.msk.bf16.gmra.mxu3 %vm663_vm0, %v2135_v10 }
  0x6c   : > { %1902 = vmatmul.msk.bf16.gmra.mxu0 %vm663_vm0, %v2125_v11  ;;  %v2326_v11 = vld [vmem:[%s3126_s3 + $0x58] sm:$0xff]  }
  0x6d   : > { %1913 = vmatmul.msk.bf16.gmra.mxu3 %vm663_vm0, %v2136_v12  ;;  %v2333_v12 = vld [vmem:[#allocation3 + $0x18] sm:$0xff]  }
  0x7c   : > { %1903 = vmatmul.msk.bf16.gmra.mxu0 %vm663_vm0, %v2126_v13 }
  0x7d   : > { %1914 = vmatmul.msk.bf16.gmra.mxu3 %vm663_vm0, %v2137_v14 }
  0x8c   : > { %1904 = vmatmul.msk.bf16.gmra.mxu0 %vm663_vm0, %v2127_v15 }
  0x9c   : > { %1905 = vmatmul.msk.bf16.gmra.mxu0 %vm663_vm0, %v2128_v16  ;;  %v2234_v16 = vunpack.c.l.bf16 %v2326_v11 }
  0xac   : > { %1906 = vmatmul.msk.bf16.gmra.mxu0 %vm663_vm0, %v2129_v17  ;;  %v2266_v17 = vunpack.c.l.bf16 %v2333_v12 }
  0xb9   : > { %v2872_v19 = vpop.f32.mrf.mxu0  ;;  %v766_v20 = vpop.f32.mrf.mxu1 }
  0xba   : > { %v947_v36 = vmul.f32 %v2226_v28, %v766_v20  ;;  %v963_v37 = vmul.f32 %v2258_v29, %v766_v20  ;;  %v2341_v20 = vld [vmem:[#allocation3 + $0x58] sm:$0xff]  }
  0xbc   : > { %1907 = vmatmul.msk.bf16.gmra.mxu0 %vm663_vm0, %v2130_v18  ;;  %v2318_v18 = vld [vmem:[%s3126_s3 + $0x18] sm:$0xff]  }
  0xbd   : > { %v2202_v26 = vunpack.c.l.bf16 %v2318_v18 }
  0xc0   : > { %v776_v46 = vpop.f32.mrf.mxu3 }
  0xc1   : > { %v2875_v21 = vpop.f32.mrf.mxu0  ;;  %v768_v27 = vpop.f32.mrf.mxu1 }
  0xc2   : > { %v948_v40 = vmul.f32 %v2227_v32, %v768_v27  ;;  %v964_v41 = vmul.f32 %v2259_v33, %v768_v27  ;;  %v2298_v27 = vunpack.c.l.bf16 %v2341_v20 }
  0xc8   : > { %v778_v4 = vpop.f32.mrf.mxu3 }
  0xc9   : > { %v726_v24 = vpop.f32.mrf.mxu0  ;;  %v771_v45 = vpop.f32.mrf.mxu1 }
  0xca   : > { %v931_v38 = vmul.f32 %v2194_v30, %v726_v24  ;;  %v979_v39 = vmul.f32 %v2290_v31, %v726_v24  ;;  %v949_v5 = vmul.f32 %v2230_v58, %v771_v45  ;;  %v965_v6 = vmul.f32 %v2262_v59, %v771_v45 }
  0xcb   : > { %v951_v30 = vmul.f32 %v2234_v16, %v776_v46  ;;  %v967_v31 = vmul.f32 %v2266_v17, %v776_v46 }
  0xcc   : > { %v2883_v47 = vadd.f32 %v963_v37, %v931_v38  ;;  %v2887_v49 = vadd.f32 %v979_v39, %v947_v36  ;;  %v2235_v38 = vunpack.c.h.bf16 %v2326_v11  ;;  %v2267_v39 = vunpack.c.h.bf16 %v2333_v12 }
  0xce   : > { %3170 = vst [vmem:[#allocation20_spill] sm:$0xff] %v2883_v47  ;;  %v952_v45 = vmul.f32 %v2235_v38, %v778_v4  ;;  %v968_v46 = vmul.f32 %v2267_v39, %v778_v4  ;;  %v2337_v38 = vld [vmem:[#allocation3 + $0x38] sm:$0xff]  }
  0xcf   : > { %3172 = vst [vmem:[#allocation22_spill] sm:$0xff] %v2887_v49 }
  0xd0   : > { %v781_v32 = vpop.f32.mrf.mxu3 }
  0xd1   : > { %v728_v42 = vpop.f32.mrf.mxu0  ;;  %v773_v0 = vpop.f32.mrf.mxu1 }
  0xd2   : > { %v932_v43 = vmul.f32 %v2195_v34, %v728_v42  ;;  %v980_v44 = vmul.f32 %v2291_v35, %v728_v42  ;;  %v950_v9 = vmul.f32 %v2231_v62, %v773_v0  ;;  %v966_v10 = vmul.f32 %v2263_v63, %v773_v0 }
  0xd3   : > { %v2206_v62 = vunpack.c.l.bf16 %v2935_v56  ;;  %v2302_v63 = vunpack.c.l.bf16 %v2937_v57  ;;  %v2283_v0 = vunpack.c.h.bf16 %v2337_v38 }
  0xd4   : > { %v2885_v48 = vadd.f32 %v964_v41, %v932_v43  ;;  %v2889_v50 = vadd.f32 %v980_v44, %v948_v40  ;;  %v2203_v40 = vunpack.c.h.bf16 %v2318_v18  ;;  %v2299_v41 = vunpack.c.h.bf16 %v2341_v20  ;;  %v2926_v43 = vld [vmem:[%s3126_s3 + $0x60] sm:$0xff]   ;;  %v2928_v44 = vld [vmem:[#allocation3 + $0x20] sm:$0xff]  }
  0xd5   : > { %v2238_v58 = vunpack.c.l.bf16 %v2926_v43  ;;  %v2270_v59 = vunpack.c.l.bf16 %v2928_v44 }
  0xd6   : > { %3171 = vst [vmem:[#allocation21_spill] sm:$0xff] %v2885_v48 }
  0xd7   : > { %3173 = vst [vmem:[#allocation23_spill] sm:$0xff] %v2889_v50  ;;  %v969_v4 = vmul.f32 %v2270_v59, %v781_v32 }
  0xd9   : > { %v731_v55 = vpop.f32.mrf.mxu0 }
  0xda   : > { %v933_v7 = vmul.f32 %v2198_v60, %v731_v55  ;;  %v981_v8 = vmul.f32 %v2294_v61, %v731_v55  ;;  %v2930_v55 = vpop.f32.mrf.mxu3 }
  0xdc   : > { %v2907_v22 = vadd.f32 %v965_v6, %v933_v7  ;;  %v2911_v24 = vadd.f32 %v981_v8, %v949_v5 }
  0xde   : > { %3174 = vst [vmem:[#allocation24_spill] sm:$0xff] %v2907_v22 }
  0xdf   : > { %3176 = vst [vmem:[#allocation26_spill] sm:$0xff] %v2911_v24 }
  0xe1   : > { %v733_v13 = vpop.f32.mrf.mxu0 }
  0xe2   : > { %v934_v14 = vmul.f32 %v2199_v1, %v733_v13  ;;  %v982_v15 = vmul.f32 %v2295_v3, %v733_v13  ;;  %v953_v3 = vmul.f32 %v2238_v58, %v781_v32  ;;  %v2951_v8 = vpop.f32.mrf.mxu3  ;;  %v2330_v32 = vld [vmem:[%s3126_s3 + $0x78] sm:$0xff]   ;;  %v2336_v58 = vld [vmem:[#allocation3 + $0x30] sm:$0xff]  }
  0xe3   : > { %v2278_v28 = vunpack.c.l.bf16 %v2336_v58  ;;  %v2251_v1 = vunpack.c.h.bf16 %v2330_v32  ;;  %v2279_v49 = vunpack.c.h.bf16 %v2336_v58 }
  0xe4   : > { %v2909_v23 = vadd.f32 %v966_v10, %v934_v14  ;;  %v2913_v25 = vadd.f32 %v982_v15, %v950_v9 }
  0xe6   : > { %3175 = vst [vmem:[#allocation25_spill] sm:$0xff] %v2909_v23 }
  0xe7   : > { %3177 = vst [vmem:[#allocation27_spill] sm:$0xff] %v2913_v25 }
  0xe9   : > { %v736_v33 = vpop.f32.mrf.mxu0 }
  0xea   : > { %v935_v34 = vmul.f32 %v2202_v26, %v736_v33  ;;  %v983_v35 = vmul.f32 %v2298_v27, %v736_v33  ;;  %v2959_v12 = vpop.f32.mrf.mxu3  ;;  %v2968_v26 = vld [vmem:[%s3126_s3 + $0x68] sm:$0xff]   ;;  %v2970_v27 = vld [vmem:[#allocation3 + $0x28] sm:$0xff]  }
  0xeb   : > { %v2243_v59 = vunpack.c.h.bf16 %v2968_v26 }
  0xec   : > { %v2919_v36 = vadd.f32 %v967_v31, %v935_v34  ;;  %v2921_v37 = vadd.f32 %v983_v35, %v951_v30  ;;  %v2975_v30 = vld [vmem:[%s3126_s3 + $0x28] sm:$0xff]   ;;  %v2977_v31 = vld [vmem:[#allocation3 + $0x68] sm:$0xff]  }
  0xee   : > { %3178 = vst [vmem:[#allocation28_spill] sm:$0xff] %v2919_v36 }
  0xef   : > { %3179 = vst [vmem:[#allocation29_spill] sm:$0xff] %v2921_v37 }
  0xf1   : > { %v738_v42 = vpop.f32.mrf.mxu0 }
  0xf2   : > { %v936_v53 = vmul.f32 %v2203_v40, %v738_v42  ;;  %v984_v54 = vmul.f32 %v2299_v41, %v738_v42  ;;  %v791_v14 = vpop.f32.mrf.mxu3  ;;  %v2322_v40 = vld [vmem:[%s3126_s3 + $0x38] sm:$0xff]   ;;  %v2345_v41 = vld [vmem:[#allocation3 + $0x78] sm:$0xff]   ;;  %v2242_v42 = vunpack.c.l.bf16 %v2968_v26 }
  0xf3   : > { %v2218_v52 = vunpack.c.l.bf16 %v2322_v40  ;;  %v2314_v51 = vunpack.c.l.bf16 %v2345_v41  ;;  %v2219_v33 = vunpack.c.h.bf16 %v2322_v40  ;;  %v973_v22 = vmul.f32 %v2278_v28, %v791_v14 }
  0xf4   : > { %v2941_v60 = vadd.f32 %v968_v46, %v936_v53  ;;  %v2943_v61 = vadd.f32 %v984_v54, %v952_v45  ;;  %v2274_v45 = vunpack.c.l.bf16 %v2970_v27  ;;  %v2210_v46 = vunpack.c.l.bf16 %v2975_v30  ;;  %v2329_v54 = vld [vmem:[%s3126_s3 + $0x70] sm:$0xff]  }
  0xf5   : > { %v2306_v53 = vunpack.c.l.bf16 %v2977_v31  ;;  %v2246_v29 = vunpack.c.l.bf16 %v2329_v54  ;;  %v2247_v2 = vunpack.c.h.bf16 %v2329_v54 }
  0xf6   : > { %3180 = vst [vmem:[#allocation30_spill] sm:$0xff] %v2941_v60 }
  0xf7   : > { %3181 = vst [vmem:[#allocation31_spill] sm:$0xff] %v2943_v61  ;;  %v957_v25 = vmul.f32 %v2246_v29, %v791_v14 }
  0xf9   : > { %v741_v5 = vpop.f32.mrf.mxu0 }
  0xfa   : > { %v937_v6 = vmul.f32 %v2206_v62, %v741_v5  ;;  %v985_v7 = vmul.f32 %v2302_v63, %v741_v5  ;;  %v793_v17 = vpop.f32.mrf.mxu3  ;;  %v2275_v62 = vunpack.c.h.bf16 %v2970_v27  ;;  %v2211_v63 = vunpack.c.h.bf16 %v2975_v30  ;;  %v2344_v5 = vld [vmem:[#allocation3 + $0x70] sm:$0xff]  }
  0xfb   : > { %v2311_v34 = vunpack.c.h.bf16 %v2344_v5  ;;  %v2315_v30 = vunpack.c.h.bf16 %v2345_v41  ;;  %v958_v41 = vmul.f32 %v2247_v2, %v793_v17 }
  0xfc   : > { %v2953_v9 = vadd.f32 %v969_v4, %v937_v6  ;;  %v2955_v10 = vadd.f32 %v985_v7, %v953_v3  ;;  %v2307_v3 = vunpack.c.h.bf16 %v2977_v31  ;;  %v2321_v4 = vld [vmem:[%s3126_s3 + $0x30] sm:$0xff]   ;;  %v2250_v6 = vunpack.c.l.bf16 %v2330_v32 }
  0xfd   : > { %v2282_v7 = vunpack.c.l.bf16 %v2337_v38  ;;  %v2215_v26 = vunpack.c.h.bf16 %v2321_v4  ;;  %v2214_v35 = vunpack.c.l.bf16 %v2321_v4  ;;  %v2310_v31 = vunpack.c.l.bf16 %v2344_v5 }
  0xfe   : > { %3182 = vst [vmem:[#allocation32_spill] sm:$0xff] %v2955_v10  ;;  %v974_v4 = vmul.f32 %v2279_v49, %v793_v17  ;;  %v2155_v49 = vld [vmem:[#allocation8 + $0x78] sm:$0xff]  ;;  %v2323_v17 = vld [vmem:[%s3126_s3 + $0x40] sm:$0xff]  }
  0xff   : > { %1186 = vmatpush.bf16.msrb.mxu3 %v2155_v49  ;;  %v3194_v49 = vld [vmem:[#allocation24_spill] sm:$0xff] }
 0x101   : > { %v2957_v11 = vpop.f32.mrf.mxu0 }
 0x102   : > { %v796_v20 = vpop.f32.mrf.mxu3 }
 0x103   : > { %v959_v50 = vmul.f32 %v2250_v6, %v796_v20  ;;  %v975_v47 = vmul.f32 %v2282_v7, %v796_v20 }
 0x109   : > { %v2961_v13 = vpop.f32.mrf.mxu0 }
 0x10a   : > { %v798_v27 = vpop.f32.mrf.mxu3  ;;  %v939_v2 = vmul.f32 %v2210_v46, %v2961_v13 }
 0x10b   : > { %v960_v23 = vmul.f32 %v2251_v1, %v798_v27  ;;  %v976_v37 = vmul.f32 %v2283_v0, %v798_v27 }
 0x111   : > { %v2963_v15 = vpop.f32.mrf.mxu0 }
 0x112   : > { %v940_v28 = vmul.f32 %v2211_v63, %v2963_v15  ;;  %v988_v29 = vmul.f32 %v2307_v3, %v2963_v15  ;;  %v2153_v3 = vld [vmem:[#allocation8 + $0x68] sm:$0xff] }
 0x119   : > { %v751_v16 = vpop.f32.mrf.mxu0 }
 0x11a   : > { %v941_v10 = vmul.f32 %v2214_v35, %v751_v16  ;;  %v989_v40 = vmul.f32 %v2310_v31, %v751_v16  ;;  %v971_v16 = vmul.f32 %v2274_v45, %v2951_v8 }
 0x11c   : > { %v1003_v45 = vadd.f32 %v971_v16, %v939_v2  ;;  %v3190_v16 = vld [vmem:[#allocation31_spill] sm:$0xff]  ;;  %v3191_v2 = vld [vmem:[#allocation29_spill] sm:$0xff] }
 0x121   : > { %v753_v18 = vpop.f32.mrf.mxu0 }
 0x122   : > { %v942_v32 = vmul.f32 %v2215_v26, %v753_v18  ;;  %v990_v38 = vmul.f32 %v2311_v34, %v753_v18  ;;  %v2154_v18 = vld [vmem:[#allocation8 + $0x70] sm:$0xff]  ;;  %v2223_v26 = vunpack.c.h.bf16 %v2323_v17 }
 0x123   : > { %1187 = vmatpush.bf16.msrb.mxu3 %v2154_v18 }
 0x124   : > { %v1006_v14 = vadd.f32 %v974_v4, %v942_v32 }
 0x127   : > { %1188 = vmatpush.bf16.msrb.mxu3 %v2153_v3  ;;  %v2166_v3 = vld [vmem:[#allocation8 + $0x10] sm:$0xff] }
 0x129   : > { %v756_v39 = vpop.f32.mrf.mxu0 }
 0x12a   : > { %v943_v48 = vmul.f32 %v2218_v52, %v756_v39  ;;  %v991_v24 = vmul.f32 %v2314_v51, %v756_v39  ;;  %v2303_v52 = vunpack.c.h.bf16 %v2937_v57  ;;  %v955_v51 = vmul.f32 %v2242_v42, %v2951_v8  ;;  %v2338_v57 = vld [vmem:[#allocation3 + $0x40] sm:$0xff]  }
 0x12b   : > { %v2286_v39 = vunpack.c.l.bf16 %v2338_v57  ;;  %v2222_v42 = vunpack.c.l.bf16 %v2323_v17  ;;  %v3203_v17 = vld [vmem:[#allocation22_spill] sm:$0xff] }
 0x12c   : > { %v1007_v5 = vadd.f32 %v975_v47, %v943_v48  ;;  %v1023_v58 = vadd.f32 %v991_v24, %v959_v50  ;;  %v956_v47 = vmul.f32 %v2243_v59, %v2959_v12  ;;  %v972_v48 = vmul.f32 %v2275_v62, %v2959_v12  ;;  %v2189_v50 = vld [vmem:[%s3126_s3] sm:$0xff]   ;;  %v2253_v24 = vld [vmem:[#allocation3] sm:$0xff]  }
 0x12d   : > { %v986_v15 = vmul.f32 %v2303_v52, %v2957_v11  ;;  %v2254_v35 = vunpack.c.l.bf16 %v2253_v24  ;;  %v2287_v59 = vunpack.c.h.bf16 %v2338_v57  ;;  %v2255_v27 = vunpack.c.h.bf16 %v2253_v24  ;;  %v3197_v24 = vld [vmem:[#allocation26_spill] sm:$0xff]  ;;  %v1917_v57 = vld [vmem:[%s3125_s2] sm:$0xf] }
 0x12e   : > { %v1020_v34 = vadd.f32 %v988_v29, %v956_v47  ;;  %v977_v31 = vmul.f32 %v2286_v39, %v2872_v19  ;;  %v3192_v47 = vpack.c.bf16 %v3190_v16, %v3191_v2  ;;  %v2146_v39 = vld [vmem:[#allocation6 + $0x70] sm:$0xff]  ;;  %v2180_v16 = vld [vmem:[#allocation8 + $0x80] sm:$0xff] }
 0x12f   : > { %v1602_v2 = vld [vmem:[%s3131_s8] sm:$0xff] }
 0x131   : > { %v758_v61 = vpop.f32.mrf.mxu0 }
 0x132   : > { %v944_v36 = vmul.f32 %v2219_v33, %v758_v61  ;;  %v992_v60 = vmul.f32 %v2315_v30, %v758_v61  ;;  %v1022_v61 = vadd.f32 %v990_v38, %v958_v41  ;;  %v1004_v33 = vadd.f32 %v972_v48, %v940_v28  ;;  %v2152_v41 = vld [vmem:[#allocation8 + $0x60] sm:$0xff]  ;;  %v3193_v48 = vld [vmem:[#allocation25_spill] sm:$0xff] }
 0x133   : > { %v978_v38 = vmul.f32 %v2287_v59, %v2875_v21  ;;  %1189 = vmatpush.bf16.msrb.mxu3 %v2152_v41  ;;  %v2144_v59 = vld [vmem:[#allocation6 + $0x60] sm:$0xff] }
 0x134   : > { %v1008_v54 = vadd.f32 %v976_v37, %v944_v36  ;;  %v1024_v6 = vadd.f32 %v992_v60, %v960_v23  ;;  %v987_v23 = vmul.f32 %v2306_v53, %v2961_v13  ;;  %v1005_v36 = vadd.f32 %v973_v22, %v941_v10  ;;  %v2140_v41 = vld [vmem:[#allocation6 + $0x40] sm:$0xff] }
 0x135   : > { %v1021_v37 = vadd.f32 %v989_v40, %v957_v25  ;;  %v3183_v60 = vunpack.c.h.bf16 %v2935_v56  ;;  %v2190_v22 = vunpack.c.l.bf16 %v2189_v50  ;;  %v3184_v25 = vunpack.c.h.bf16 %v2926_v43 }
 0x136   : > { %v1032_v0 = vpack.c.bf16 %v1008_v54, %v1007_v5  ;;  %v1040_v1 = vpack.c.bf16 %v1024_v6, %v1023_v58  ;;  %v1031_v13 = vpack.c.bf16 %v1006_v14, %v1005_v36  ;;  %v3185_v56 = vunpack.c.h.bf16 %v2928_v44  ;;  %v3186_v58 = vld [vmem:[#allocation32_spill] sm:$0xff] }
 0x137   : > { %v938_v8 = vmul.f32 %v3183_v60, %v2957_v11  ;;  %v1039_v20 = vpack.c.bf16 %v1022_v61, %v1021_v37  ;;  %v954_v10 = vmul.f32 %v3184_v25, %v2930_v55  ;;  %v1019_v46 = vadd.f32 %v987_v23, %v955_v51  ;;  %v3188_v14 = vld [vmem:[#allocation28_spill] sm:$0xff]  ;;  %v3196_v23 = vld [vmem:[#allocation27_spill] sm:$0xff]  ;;  %v3199_v60 = vld [vmem:[#allocation21_spill] sm:$0xff] }
 0x138   : > { %1053 = vmatpush.bf16.msrb.mxu1 %v1032_v0  ;;  %1067 = vmatpush.bf16.msra.mxu2 %v1040_v1  ;;  %v970_v11 = vmul.f32 %v3185_v56, %v2930_v55  ;;  %v2191_v53 = vunpack.c.h.bf16 %v2189_v50  ;;  %v1030_v7 = vpack.c.bf16 %v1004_v33, %v1003_v45  ;;  %v929_v55 = vmul.f32 %v2190_v22, %v2872_v19  ;;  %v2151_v19 = vld [vmem:[#allocation8 + $0x58] sm:$0xff]  ;;  %v2149_v37 = vld [vmem:[#allocation8 + $0x48] sm:$0xff]  ;;  %v2148_v25 = vld [vmem:[#allocation8 + $0x40] sm:$0xff] }
 0x139   : > { %v761_v12 = vpop.f32.mrf.mxu0  ;;  %v1018_v63 = vadd.f32 %v986_v15, %v954_v10  ;;  %v1038_v43 = vpack.c.bf16 %v1020_v34, %v1019_v46  ;;  %1190 = vmatpush.bf16.msrb.mxu3 %v2151_v19  ;;  %v3195_v50 = vpack.c.bf16 %v3193_v48, %v3194_v49  ;;  %v3198_v36 = vpack.c.bf16 %v3196_v23, %v3197_v24  ;;  %v1919_v33 = vld [vmem:[%s3125_s2 + $0x8] sm:$0xf0]  ;;  %v2145_v45 = vld [vmem:[#allocation6 + $0x68] sm:$0xff]  ;;  %v3205_v46 = vld [vmem:[#allocation19_spill] sm:$0xff] }
 0x13a   : > { %v1002_v62 = vadd.f32 %v970_v11, %v938_v8  ;;  %v961_v30 = vmul.f32 %v2254_v35, %v761_v12  ;;  %v945_v44 = vmul.f32 %v2222_v42, %v761_v12  ;;  %v930_v32 = vmul.f32 %v2191_v53, %v2875_v21  ;;  %v3187_v21 = vld [vmem:[#allocation30_spill] sm:$0xff]  ;;  %v3200_v8 = vld [vmem:[#allocation20_spill] sm:$0xff]  ;;  %v3202_v12 = vld [vmem:[#allocation23_spill] sm:$0xff] }
 0x13b   : > { %v1037_v6 = vpack.c.bf16 %v1018_v63, %v3186_v58  ;;  %v3189_v61 = vpack.c.bf16 %v3187_v21, %v3188_v14  ;;  %v3201_v15 = vpack.c.bf16 %v3199_v60, %v3200_v8  ;;  %v3204_v18 = vpack.c.bf16 %v3202_v12, %v3203_v17  ;;  %v2171_v34 = vld [vmem:[#allocation8 + $0x38] sm:$0xff]  ;;  %v2170_v35 = vld [vmem:[#allocation8 + $0x30] sm:$0xff]  ;;  %v2169_v42 = vld [vmem:[#allocation8 + $0x28] sm:$0xff] }
 0x13c   : > { %1054 = vmatpush.bf16.msrb.mxu1 %v1031_v13  ;;  %1068 = vmatpush.bf16.msra.mxu2 %v1039_v20  ;;  %v1029_v54 = vpack.c.bf16 %v1002_v62, %v2953_v9  ;;  %v993_v52 = vadd.f32 %v961_v30, %v929_v55  ;;  %v1009_v29 = vadd.f32 %v977_v31, %v945_v44  ;;  %v2150_v9 = vld [vmem:[#allocation8 + $0x50] sm:$0xff]  ;;  %v2139_v13 = vld [vmem:[%s3125_s2 + $0x4] sm:$0xf0]  ;;  %v2168_v53 = vld [vmem:[#allocation8 + $0x20] sm:$0xff]  ;;  %v2630_v48 = vmov 0  }
 0x13d   : > { %1191 = vmatpush.bf16.msrb.mxu3 %v2150_v9  ;;  %v2138_v20 = vld [vmem:[%s3125_s2 + $0x4] sm:$0xf]  ;;  %v2147_v22 = vld [vmem:[#allocation6 + $0x78] sm:$0xff]  ;;  %v1918_v10 = vor.u32 %v2139_v13, %v1917_v57  ;;  %v2161_v55 = vld [vmem:[#allocation6 + $0x28] sm:$0xff]  ;;  %2440 = vset.pattern.permute.xlu0 %v2630_v48 }
 0x13e   : > { %v1922_v56 = vor.u32 %v2138_v20, %v1919_v33  ;;  %v2163_v11 = vld [vmem:[#allocation6 + $0x38] sm:$0xff]  ;;  %v2178_v30 = vld [vmem:[#allocation6 + $0xb0] sm:$0xff]  ;;  %v2177_v31 = vld [vmem:[#allocation6 + $0xa8] sm:$0xff]  ;;  %2441 = vset.pattern.permute.xlu1 %v2630_v48  ;;  %1606 = vperm.xlu0 %2440, %v1602_v2   ;;  %v1103_v33 = vlaneseq }
 0x13f   : > { %v2167_v62 = vld [vmem:[#allocation8 + $0x18] sm:$0xff]  ;;  %v2142_v44 = vld [vmem:[#allocation6 + $0x50] sm:$0xff]  ;;  %v2156_v19 = vld [vmem:[#allocation6] sm:$0xff] }
 0x140   : > { %1055 = vmatpush.bf16.msrb.mxu1 %v1030_v7  ;;  %1069 = vmatpush.bf16.msra.mxu2 %v1038_v43  ;;  %v2143_v63 = vld [vmem:[#allocation6 + $0x58] sm:$0xff]  ;;  %v2165_v7 = vld [vmem:[#allocation8 + $0x8] sm:$0xff]  ;;  %v2164_v43 = vld [vmem:[#allocation8] sm:$0xff] }
 0x141   : > { %v763_v40 = vpop.f32.mrf.mxu0  ;;  %1192 = vmatpush.bf16.msrb.mxu3 %v2149_v37  ;;  %v2158_v58 = vld [vmem:[#allocation6 + $0x10] sm:$0xff]  ;;  %v2183_v21 = vld [vmem:[#allocation8 + $0x98] sm:$0xff] }
 0x142   : > { %v946_v4 = vmul.f32 %v2223_v26, %v763_v40  ;;  %v962_v5 = vmul.f32 %v2255_v27, %v763_v40  ;;  %v2179_v26 = vld [vmem:[#allocation6 + $0xb8] sm:$0xff]  ;;  %v2162_v27 = vld [vmem:[#allocation6 + $0x30] sm:$0xff]  ;;  %v2176_v40 = vld [vmem:[#allocation6 + $0xa0] sm:$0xff] }
 0x143   : > { %v2182_v14 = vld [vmem:[#allocation8 + $0x90] sm:$0xff]  ;;  %v1617_v23 = vld [vmem:[%s3132_s9 + $0x8] sm:$0xff] }
 0x144   : > { %v994_v51 = vadd.f32 %v962_v5, %v930_v32  ;;  %v1010_v28 = vadd.f32 %v978_v38, %v946_v4  ;;  %1056 = vmatpush.bf16.msrb.mxu1 %v1029_v54  ;;  %1070 = vmatpush.bf16.msra.mxu2 %v1037_v6  ;;  %v2141_v32 = vld [vmem:[#allocation6 + $0x48] sm:$0xff]  ;;  %v2160_v38 = vld [vmem:[#allocation6 + $0x20] sm:$0xff]  ;;  %v2159_v4 = vld [vmem:[#allocation6 + $0x18] sm:$0xff] }
 0x145   : > { %1193 = vmatpush.bf16.msrb.mxu3 %v2148_v25  ;;  %v2187_v5 = vld [vmem:[#allocation8 + $0xb8] sm:$0xff]  ;;  %v2186_v6 = vld [vmem:[#allocation8 + $0xb0] sm:$0xff]  ;;  %v1104_v25 = vshrl.u32 %v1103_v33, 7 }
 0x146   : > { %v1025_v0 = vpack.c.bf16 %v994_v51, %v993_v52  ;;  %v1033_v1 = vpack.c.bf16 %v1010_v28, %v1009_v29  ;;  %v2175_v54 = vld [vmem:[#allocation6 + $0x98] sm:$0xff]  ;;  %v2174_v52 = vld [vmem:[#allocation6 + $0x90] sm:$0xff]  ;;  %v2157_v51 = vld [vmem:[#allocation6 + $0x8] sm:$0xff] }
 0x147   : > { %v2185_v28 = vld [vmem:[#allocation8 + $0xa8] sm:$0xff]  ;;  %vm1422_vm1 = vcmp.lt.s32.totalorder %v1104_v25, 1  ;;  %vm1262_vm2 = vcmp.eq.s32.totalorder %v1104_v25, 0  ;;  %vm1589_vm3 = vcmp.lt.s32.totalorder %v1104_v25, 7 }
 0x148   : > { %1057 = vmatpush.bf16.msrb.mxu1 %v3189_v61  ;;  %1071 = vmatpush.bf16.msra.mxu2 %v3192_v47  ;;  %v2173_v29 = vld [vmem:[#allocation6 + $0x88] sm:$0xff]  ;;  %v1616_v47 = vld [vmem:[%s3132_s9] sm:$0xff] }
 0x149   : > { %1406 = vmatpush.bf16.msra.mxu3 %v2163_v11  ;;  %v2181_v61 = vld [vmem:[#allocation8 + $0x88] sm:$0xff]  ;;  %1620 = vperm.xlu1 %2441, %v1616_v47  }
 0x14a   : > { %1194 = vmatmul.bf16.vlgmr.msrb.gmra.mxu3 %v3205_v46 }
 0x14c   : > { %1058 = vmatpush.bf16.msrb.mxu1 %v3195_v50  ;;  %1072 = vmatpush.bf16.msra.mxu2 %v3198_v36  ;;  %v1603_v50 = vld [vmem:[%s3131_s8 + $0x8] sm:$0xff] }
 0x14d   : > { %1407 = vmatpush.bf16.msra.mxu3 %v2162_v27  ;;  %1611 = vperm.xlu0 %2440, %v1603_v50  }
 0x150   : > { %1059 = vmatpush.bf16.msrb.mxu1 %v3201_v15  ;;  %1073 = vmatpush.bf16.msra.mxu2 %v3204_v18 }
 0x151   : > { %1408 = vmatpush.bf16.msra.mxu3 %v2161_v55  ;;  %1625 = vperm.xlu1 %2441, %v1617_v23  }
 0x154   : > { %1060 = vmatpush.bf16.msrb.mxu1 %v1025_v0  ;;  %1074 = vmatpush.bf16.msra.mxu2 %v1033_v1  ;;  %v2184_v0 = vld [vmem:[#allocation8 + $0xa0] sm:$0xff] }
 0x155   : > { %1409 = vmatpush.bf16.msra.mxu3 %v2160_v38  ;;  %v2172_v1 = vld [vmem:[#allocation6 + $0x80] sm:$0xff] }
 0x157   : > { %1061 = vmatmul.bf16.vlgmr.msrb.gmra.mxu1 %v1918_v10  ;;  %1075 = vmatmul.bf16.vlgmr.msra.gmra.mxu2 %v1922_v56 }
 0x158   : > { %1344 = vmatpush.bf16.msrb.mxu2 %v2171_v34  ;;  %1248 = vmatpush.bf16.msra.mxu1 %v2147_v22 }
 0x159   : > { %1410 = vmatpush.bf16.msra.mxu3 %v2159_v4 }
 0x15c   : > { %1345 = vmatpush.bf16.msrb.mxu2 %v2170_v35  ;;  %1249 = vmatpush.bf16.msra.mxu1 %v2146_v39 }
 0x15d   : > { %1411 = vmatpush.bf16.msra.mxu3 %v2158_v58 }
 0x160   : > { %1346 = vmatpush.bf16.msrb.mxu2 %v2169_v42  ;;  %1250 = vmatpush.bf16.msra.mxu1 %v2145_v45 }
 0x161   : > { %1412 = vmatpush.bf16.msra.mxu3 %v2157_v51 }
 0x164   : > { %1347 = vmatpush.bf16.msrb.mxu2 %v2168_v53  ;;  %1251 = vmatpush.bf16.msra.mxu1 %v2144_v59  ;;  %v1105_v53 = vadd.s32 8, %v1104_v25 }
 0x165   : > { %1413 = vmatpush.bf16.msra.mxu3 %v2156_v19 }
 0x166   : > { %vm1430_vm4 = vcmp.eq.s32.totalorder %v1105_v53, 15 }
 0x168   : > { %1348 = vmatpush.bf16.msrb.mxu2 %v2167_v62  ;;  %1252 = vmatpush.bf16.msra.mxu1 %v2143_v63 }
 0x16c   : > { %1349 = vmatpush.bf16.msrb.mxu2 %v2166_v3  ;;  %1253 = vmatpush.bf16.msra.mxu1 %v2142_v44 }
 0x170   : > { %1350 = vmatpush.bf16.msrb.mxu2 %v2165_v7  ;;  %1254 = vmatpush.bf16.msra.mxu1 %v2141_v32 }
 0x174   : > { %1351 = vmatpush.bf16.msrb.mxu2 %v2164_v43  ;;  %1255 = vmatpush.bf16.msra.mxu1 %v2140_v41 }
 0x177   : > { %1352 = vmatmul.bf16.vlgmr.msrb.gmra.mxu2 %v3205_v46 }
 0x178   : > { %1573 = vmatpush.bf16.msra.mxu2 %v2179_v26  ;;  %1511 = vmatpush.bf16.msrb.mxu1 %v2187_v5 }
 0x17c   : > { %1574 = vmatpush.bf16.msra.mxu2 %v2178_v30  ;;  %1512 = vmatpush.bf16.msrb.mxu1 %v2186_v6 }
 0x180   : > { %1575 = vmatpush.bf16.msra.mxu2 %v2177_v31  ;;  %1513 = vmatpush.bf16.msrb.mxu1 %v2185_v28  ;;  %v2442_v31 = vld [vmem:[%s3130_s7] ss:$0 sm:$0xff] }
 0x184   : > { %1576 = vmatpush.bf16.msra.mxu2 %v2176_v40  ;;  %1514 = vmatpush.bf16.msrb.mxu1 %v2184_v0 }
 0x188   : > { %1577 = vmatpush.bf16.msra.mxu2 %v2175_v54  ;;  %1515 = vmatpush.bf16.msrb.mxu1 %v2183_v21 }
 0x18c   : > { %1578 = vmatpush.bf16.msra.mxu2 %v2174_v52  ;;  %1516 = vmatpush.bf16.msrb.mxu1 %v2182_v14 }
 0x190   : > { %1579 = vmatpush.bf16.msra.mxu2 %v2173_v29  ;;  %1517 = vmatpush.bf16.msrb.mxu1 %v2181_v61 }
 0x194   : > { %1580 = vmatpush.bf16.msra.mxu2 %v2172_v1  ;;  %1518 = vmatpush.bf16.msrb.mxu1 %v2180_v16 }
 0x1bb   : > { %v1621_v26 = vpop.permute.xlu1 %1620 }
 0x1c3   : > { %v1626_v29 = vpop.permute.xlu1 %1625 }
 0x1cd   : > { %v1195_v8 = vpop.f32.mrf.mxu3 }
 0x1d4   : > { %v1062_v9 = vpop.f32.mrf.mxu1 }
 0x1d5   : > { %v1197_v12 = vpop.f32.mrf.mxu3 }
 0x1da   : > { %v1076_v49 = vpop.f32.mrf.mxu2 }
 0x1db   : > { %v1077_v37 = vadd.f32 %v1076_v49, %v1062_v9 }
 0x1dc   : > { %v1064_v24 = vpop.f32.mrf.mxu1 }
 0x1e2   : > { %v1078_v36 = vpop.f32.mrf.mxu2 }
 0x1e3   : > { %v1079_v57 = vadd.f32 %v1078_v36, %v1064_v24 }
 0x1e5   : > { %v1102_v60 = vpack.c.bf16 %v1079_v57, %v1077_v37 }
 0x1e7   : > { %1256 = vmatmul.bf16.vlgmr.msra.gmra.mxu1 %v1102_v60  ;;  %1414 = vmatmul.bf16.vlgmr.msra.gmra.mxu3 %v1102_v60 }
 0x1e8   : > { %1581 = vmatmul.bf16.vlgmr.msra.gmra.mxu2 %v1102_v60 }
 0x1f7   : > { %1519 = vmatmul.bf16.vlgmr.msrb.gmra.mxu1 %v3205_v46  ;;  %v1607_v46 = vpop.permute.xlu0 %1606 }
 0x1fa   : > { %v1353_v15 = vpop.f32.mrf.mxu2 }
 0x1ff   : > { %v1612_v6 = vpop.permute.xlu0 %1611 }
 0x202   : > { %v1355_v18 = vpop.f32.mrf.mxu2 }
 0x264   : > { %v1257_v17 = vpop.f32.mrf.mxu1 }
 0x265   : > { %v1258_v7 = vadd.f32 %v1257_v17, %v1195_v8 }
 0x26a   : > { %v1415_v13 = vpop.f32.mrf.mxu3 }
 0x26b   : > { %v1582_v34 = vpop.f32.mrf.mxu2  ;;  %v1416_v56 = vadd.f32 %v1415_v13, %v1353_v15 }
 0x26c   : > { %v1259_v20 = vpop.f32.mrf.mxu1 }
 0x26d   : > { %v1420_v39 = vrot.slane %v1416_v56, 7  ;;  %v1260_v27 = vadd.f32 %v1259_v20, %v1197_v12 }
 0x272   : > { %v1417_v22 = vpop.f32.mrf.mxu3 }
 0x273   : > { %v1418_v10 = vadd.f32 %v1417_v22, %v1355_v18  ;;  %v1584_v59 = vpop.f32.mrf.mxu2 }
 0x274   : > { %v1520_v11 = vpop.f32.mrf.mxu1 }
 0x275   : > { %v1421_v35 = vrot.slane %v1418_v10, 7  ;;  %v1583_v45 = vadd.f32 %v1582_v34, %v1520_v11 }
 0x277   : > { %v1424_v42 = vsel %vm1422_vm1, %v1421_v35, %v1420_v39  ;;  %v1423_v43 = vsel %vm1422_vm1, %v1420_v39, %v1421_v35  ;;  %v1587_v30 = vrot.slane %v1583_v45, 1 }
 0x278   : > { %v1425_v63 = vsel %vm1262_vm2, 0.0, %v1424_v42  ;;  %v1428_v40 = vadd.f32 %v1423_v43, %v1260_v27 }
 0x279   : > { %v1427_v55 = vadd.f32 %v1425_v63, %v1258_v7 }
 0x27c   : > { %v1522_v62 = vpop.f32.mrf.mxu1 }
 0x27d   : > { %v1585_v3 = vadd.f32 %v1584_v59, %v1522_v62 }
 0x27f   : > { %v1588_v44 = vrot.slane %v1585_v3, 1 }
 0x281   : > { %v1590_v32 = vsel %vm1589_vm3, %v1587_v30, %v1588_v44  ;;  %v1591_v38 = vsel %vm1589_vm3, %v1588_v44, %v1587_v30 }
 0x282   : > { %v1594_v41 = vadd.f32 %v1590_v32, %v1427_v55  ;;  %v1593_v4 = vsel %vm1430_vm4, 0.0, %v1591_v38 }
 0x283   : > { %v1595_v5 = vadd.f32 %v1593_v4, %v1428_v40 }
 0x284   : > { %v1600_v54 = vadd.f32 %v2442_v31, %v1594_v41 }
 0x285   : > { %v1601_v58 = vadd.f32 %v2442_v31, %v1595_v5 }
 0x286   : > { %v1614_v52 = vmul.f32 %v1607_v46, %v1600_v54 }
 0x287   : > { %v1615_v51 = vmul.f32 %v1612_v6, %v1601_v58 }
 0x288   : > { %v1628_v28 = vadd.f32 %v1621_v26, %v1614_v52 }
 0x289   : > { %v1629_v19 = vadd.f32 %v1626_v29, %v1615_v51 }
 0x28a   : > { %v1632_v0 = vmin.f32 %v1628_v28, 0.0  ;;  %vm1630_vm5 = vcmp.gt.f32.partialorder %v1628_v28, 0.0 }
 0x28b   : > { %v1633_v1 = vmin.f32 %v1629_v19, 0.0  ;;  %vm1631_vm6 = vcmp.gt.f32.partialorder %v1629_v19, 0.0 }
 0x28c   : > { %v1634_v21 = vmul.f32 1.442695, %v1632_v0 }
 0x28d   : > { %v1636_v14 = vmul.f32 1.442695, %v1633_v1 }
 0x28e   : > { %2443 = vpow2.f32 %v1634_v21 }
 0x28f   : > { %2445 = vpow2.f32 %v1636_v14 }
 0x294   : > { %v2444_v61 = vpop.eup %2443 }
 0x295   : > { %v2446_v16 = vpop.eup %2445  ;;  %v2115_v2 = vadd.f32 -1.0, %v2444_v61 }
 0x296   : > { %v2116_v47 = vadd.f32 -1.0, %v2446_v16 }
 0x297   : > { %v1640_v9 = vsel %vm1630_vm5, %v1628_v28, %v2115_v2 }
 0x298   : > { %1642 = vst [vmem:[%s522_s29] sm:$0xff] %v1640_v9  ;;  %v1641_v48 = vsel %vm1631_vm6, %v1629_v19, %v2116_v47 }
 0x299   : > { %1643 = vst [vmem:[%s522_s29 + $0x8] sm:$0xff] %v1641_v48 }
 0x29a   : > { %2564 = shalt.err (!%p2561_p10)
}
 0x29b   : > { %s2631_s16 = smov 128   ;;  %s2632_s23 = smov 256  }
 0x29c   : > { %s2633_s28 = smov 8  }
 0x29d   : > { %2360 = dma.vmem_to_hbm [thread:$0]  (%p2732_p5), %s3086_s30, 256, %s1659_s11, %s1645_s13, %s2631_s16, %s2632_s23, %s2633_s28  }
 0x29e PF: > { %s3209_s20 = sld [smem:[#allocation13_spill]]  ;;  %p2373_p12 = pnand %p1822_p2, %p2745_p11 }
 0x2a0   : > { %p2374_p13 = pneg %p2373_p12 }
 0x2a4   : > { %s1673_s29 = sand.u32 1, %s3209_s20  }
 0x2a5   : > { %s1674_s24 = scalar_lea.sflag [#allocation5], %s1673_s29 }
 0x2a6   : > { %2598 = dma.done.wait (%p2374_p13), %s1674_s24, 256  }
 0x2a7   : > { %2600 = vsyncadd (%p2374_p13), %s1674_s24, 4294967040  ;;  %s25_s18 = sadd.s32 1, %s2623_s18   ;;  %s3211_s26 = sld [smem:[#allocation17_spill]] }
 0x2a8   : > { %p22_p0 = scmp.ge.s32.totalorder %s25_s18, 4   ;;  %s3212_s30 = sld [smem:[#allocation15_spill]] }
 0x2a9   : > { %s3213_s13 = smov %s2607_s14  ;;  %s3214_s14 = smov %s2611_s15 }
 0x2aa   : > { %s3216_s16 = smov %s2619_s17  ;;  %24 = sbr.rel (!%p22_p0) target bundleno = 9 (0x9), region = 176 }
 0x2ad   : > { %s3215_s15 = smov %s3211_s26 }
 0x2ae   : > { %s3217_s17 = smov %s3212_s30 }
 0x2af   :  { %1680 = vsyncpa [#allocation4], 1 }
 0x2b0   :  { %1682 = vsyncpa [#allocation4 + $0x1], 1 }
 0x2b1   :  { %1683 = vsyncpa [#allocation7], 1 }
 0x2b2   :  { %1684 = vsyncpa [#allocation5], 1 }
 0x2b3   :  { %1686 = vsyncpa [#allocation5 + $0x1], 1 }

</bundles_post_ra>
